<compile_context>
chip_gen: v5e
topology: v5e:2x2
jax: 0.10.0
libtpu: 0.0.40
codegen_flags: <defaults>
</compile_context>

<pallas_src>
import functools

import jax
import jax.numpy as jnp
from jax.experimental import pallas as pl
from jax.experimental.pallas import tpu as pltpu

LANES = 128
SUBLANES = 8
TARGET_BLOCK_ROWS = 4096      # 2 MiB per f32 input block; sweep 1024-8192
NUM_PARALLEL_CHUNKS = 2       # lets v7x split the reduction across 2 TCs


def _round_up(x, m):
    return ((x + m - 1) // m) * m


def _dice_partial_kernel(x_ref, t_ref, o_ref, *, n, block_rows, steps):
    """Accumulate [intersection, sum(sigmoid(x)), sum(t)] partial sums.

    o_ref block is (1, 3, 8, 128) and stays resident across the inner
    ("arbitrary") grid axis; it is the accumulator.
    """
    chunk = pl.program_id(0)
    i = pl.program_id(1)

    @pl.when(i == 0)
    def _():
        o_ref[...] = jnp.zeros_like(o_ref)

    # Global element index of every value in this block.  Masking against the
    # true length n makes lane-pad zeros, the ragged edge block's unspecified
    # rows, and fully-out-of-range duplicate blocks contribute exactly zero.
    blk = chunk * steps + i
    base = blk * (block_rows * LANES)
    row = jax.lax.broadcasted_iota(jnp.int32, (block_rows, LANES), 0)
    lane = jax.lax.broadcasted_iota(jnp.int32, (block_rows, LANES), 1)
    valid = (base + row * LANES + lane) < n

    x = x_ref[...].astype(jnp.float32)
    t = t_ref[...].astype(jnp.float32)
    p = jnp.where(valid, jax.nn.sigmoid(x), 0.0)
    t = jnp.where(valid, t, 0.0)

    # Fold block_rows -> 8 sublanes with pure VPU adds (tile-aligned reshape,
    # no cross-lane XLU work in the hot loop).
    def fold(v):
        return jnp.sum(v.reshape(block_rows // SUBLANES, SUBLANES, LANES), axis=0)

    o_ref[0, 0] += fold(p * t)   # intersection partials
    o_ref[0, 1] += fold(p)       # sum(sigmoid(inputs)) partials
    o_ref[0, 2] += fold(t)       # sum(targets) partials


def dice_loss(inputs, targets, smooth=1.0):
    """Pallas TPU implementation of DiceLoss.forward (returns f32 scalar)."""
    # bool targets have awkward TPU layouts; everything else goes in natively
    # and is cast to f32 inside the kernel (no wrapper-side upcast copies).
    if targets.dtype == jnp.bool_:
        targets = targets.astype(jnp.float32)

    x = jnp.ravel(inputs)
    t = jnp.ravel(targets)
    n = x.shape[0]

    # Pad only to the 128-lane boundary (usually a no-op; <128 elements).
    # Pad values are irrelevant because the kernel masks against n.
    rem = n % LANES
    if rem:
        x = jnp.pad(x, (0, LANES - rem))
        t = jnp.pad(t, (0, LANES - rem))
    rows = x.shape[0] // LANES
    x2 = x.reshape(rows, LANES)
    t2 = t.reshape(rows, LANES)

    block_rows = min(TARGET_BLOCK_ROWS, _round_up(rows, SUBLANES))
    num_blocks = pl.cdiv(rows, block_rows)
    chunks = NUM_PARALLEL_CHUNKS
    steps = pl.cdiv(num_blocks, chunks)
    last_block = num_blocks - 1

    def in_map(c, i):
        # Clamp so over-covered grid steps never issue an OOB DMA; their
        # contribution is zeroed in-kernel by the element mask.
        return (jnp.minimum(c * steps + i, last_block), 0)

    partials = pl.pallas_call(
        functools.partial(
            _dice_partial_kernel, n=n, block_rows=block_rows, steps=steps
        ),
        out_shape=jax.ShapeDtypeStruct((chunks, 3, SUBLANES, LANES), jnp.float32),
        grid_spec=pltpu.PrefetchScalarGridSpec(
            num_scalar_prefetch=0,
            grid=(chunks, steps),
            in_specs=[
                pl.BlockSpec((block_rows, LANES), in_map),
                pl.BlockSpec((block_rows, LANES), in_map),
            ],
            out_specs=pl.BlockSpec(
                (1, 3, SUBLANES, LANES), lambda c, i: (c, 0, 0, 0)
            ),
        ),
        compiler_params=pltpu.CompilerParams(
            dimension_semantics=("parallel", "arbitrary"),
            vmem_limit_bytes=32 * 1024 * 1024,
        ),
    )(x2, t2)

    # Tiny final combine (3 * chunks * 1024 floats) outside the kernel.
    sums = jnp.sum(partials, axis=(0, 2, 3))
    intersection, sum_p, sum_t = sums[0], sums[1], sums[2]
    dice = (2.0 * intersection + smooth) / (sum_p + sum_t + smooth)
    return 1.0 - dice


def dice_loss_ref(inputs, targets, smooth=1.0):
    p = jax.nn.sigmoid(inputs.astype(jnp.float32)).ravel()
    t = targets.astype(jnp.float32).ravel()
    intersection = jnp.sum(p * t)
    dice = (2.0 * intersection + smooth) / (jnp.sum(p) + jnp.sum(t) + smooth)
    return 1.0 - dice


if __name__ == "__main__":
    key = jax.random.PRNGKey(0)
    k1, k2 = jax.random.split(key)
    B, C, H, W = 2, 4, 16, 16  # NCHW, like the PyTorch module's typical inputs
    inputs = jax.random.normal(k1, (B, C, H, W), dtype=jnp.float32)
    targets = (jax.random.uniform(k2, (B, C, H, W)) > 0.5).astype(jnp.float32)

    loss = dice_loss(inputs, targets, smooth=1.0)
    loss = jax.block_until_ready(loss)

    ref = dice_loss_ref(inputs, targets, smooth=1.0)
    assert jnp.allclose(loss, ref, atol=1e-5, rtol=1e-5), (loss, ref)
    print("KERNEL_OK")
</pallas_src>

<mosaic_0001>
module attributes {stable_mosaic.version = 11 : i64} {
  func.func @_dice_partial_kernel(%arg0: i32, %arg1: i32, %arg2: memref<16x128xf32, #tpu.memory_space<vmem>>, %arg3: memref<16x128xf32, #tpu.memory_space<vmem>>, %arg4: memref<1x3x8x128xf32, #tpu.memory_space<vmem>>) attributes {dimension_semantics = [#tpu.dimension_semantics<parallel>, #tpu.dimension_semantics<arbitrary>], iteration_bounds = array<i64: 2, 1>, scalar_prefetch = 0 : i64, scratch_operands = 0 : i64, tpu.core_type = #tpu.core_type<tc>, window_params = [{transform_indices = @transform_0, window_bounds = array<i64: 16, 128>}, {transform_indices = @transform_1, window_bounds = array<i64: 16, 128>}, {transform_indices = @transform_2, window_bounds = array<i64: 1, 3, 8, 128>}]} {
    %c0_i32 = arith.constant 0 : i32
    %0 = arith.cmpi eq, %arg1, %c0_i32 : i32
    %1 = arith.extui %0 : i1 to i32
    %c0_i32_0 = arith.constant 0 : i32
    %2 = arith.cmpi ne, %1, %c0_i32_0 : i32
    scf.if %2 {
      %cst_32 = arith.constant 0.000000e+00 : f32
      %51 = vector.broadcast %cst_32 : f32 to vector<1x3x8x128xf32>
      %c0_33 = arith.constant 0 : index
      %c0_34 = arith.constant 0 : index
      %c0_35 = arith.constant 0 : index
      %c0_36 = arith.constant 0 : index
      %52 = vector.load %arg4[%c0_33, %c0_34, %c0_35, %c0_36] : memref<1x3x8x128xf32, #tpu.memory_space<vmem>>, vector<1x3x8x128xf32>
      tpu.vector_store %arg4[%c0_33, %c0_34, %c0_35, %c0_36], %51 {strides = array<i32>} : memref<1x3x8x128xf32, #tpu.memory_space<vmem>>, vector<1x3x8x128xf32>,
    } else {
    }
    %c1_i32 = arith.constant 1 : i32
    %3 = arith.muli %arg0, %c1_i32 : i32
    %4 = arith.addi %3, %arg1 : i32
    %c2048_i32 = arith.constant 2048 : i32
    %5 = arith.muli %4, %c2048_i32 : i32
    %6 = tpu.iota {dimensions = array<i32: 0>} : vector<16x128xi32>
    %7 = tpu.iota {dimensions = array<i32: 1>} : vector<16x128xi32>
    %c128_i32 = arith.constant 128 : i32
    %8 = vector.broadcast %c128_i32 : i32 to vector<16x128xi32>
    %9 = arith.muli %6, %8 : vector<16x128xi32>
    %10 = vector.broadcast %5 : i32 to vector<16x128xi32>
    %11 = arith.addi %10, %9 : vector<16x128xi32>
    %12 = arith.addi %11, %7 : vector<16x128xi32>
    %c2048_i32_1 = arith.constant 2048 : i32
    %13 = vector.broadcast %c2048_i32_1 : i32 to vector<16x128xi32>
    %14 = arith.cmpi slt, %12, %13 : vector<16x128xi32>
    %c0 = arith.constant 0 : index
    %c0_2 = arith.constant 0 : index
    %15 = vector.load %arg2[%c0, %c0_2] : memref<16x128xf32, #tpu.memory_space<vmem>>, vector<16x128xf32>
    %c0_3 = arith.constant 0 : index
    %c0_4 = arith.constant 0 : index
    %16 = vector.load %arg3[%c0_3, %c0_4] : memref<16x128xf32, #tpu.memory_space<vmem>>, vector<16x128xf32>
    %17 = arith.negf %15 : vector<16x128xf32>
    %18 = math.exp %17 : vector<16x128xf32>
    %cst = arith.constant 1.000000e+00 : f32
    %19 = vector.broadcast %cst : f32 to vector<16x128xf32>
    %20 = arith.addf %19, %18 : vector<16x128xf32>
    %21 = arith.divf %19, %20 : vector<16x128xf32>
    %cst_5 = arith.constant 0.000000e+00 : f32
    %22 = vector.broadcast %cst_5 : f32 to vector<16x128xf32>
    %23 = arith.select %14, %21, %22 : vector<16x128xi1>, vector<16x128xf32>
    %cst_6 = arith.constant 0.000000e+00 : f32
    %24 = vector.broadcast %cst_6 : f32 to vector<16x128xf32>
    %25 = arith.select %14, %16, %24 : vector<16x128xi1>, vector<16x128xf32>
    %c0_7 = arith.constant 0 : index
    %c0_8 = arith.constant 0 : index
    %c0_9 = arith.constant 0 : index
    %c0_10 = arith.constant 0 : index
    %26 = vector.load %arg4[%c0_7, %c0_8, %c0_9, %c0_10] : memref<1x3x8x128xf32, #tpu.memory_space<vmem>>, vector<1x1x8x128xf32>
    %27 = vector.shape_cast %26 : vector<1x1x8x128xf32> to vector<8x128xf32>
    %28 = arith.mulf %23, %25 : vector<16x128xf32>
    %29 = vector.shape_cast %28 : vector<16x128xf32> to vector<2x8x128xf32>
    %cst_11 = arith.constant dense<0.000000e+00> : vector<8x128xf32>
    %30 = vector.multi_reduction <add>, %29, %cst_11 [0] : vector<2x8x128xf32> to vector<8x128xf32>
    %31 = arith.addf %27, %30 : vector<8x128xf32>
    %c0_12 = arith.constant 0 : index
    %c0_13 = arith.constant 0 : index
    %c0_14 = arith.constant 0 : index
    %c0_15 = arith.constant 0 : index
    %32 = vector.load %arg4[%c0_12, %c0_13, %c0_14, %c0_15] : memref<1x3x8x128xf32, #tpu.memory_space<vmem>>, vector<1x1x8x128xf32>
    %33 = vector.shape_cast %32 : vector<1x1x8x128xf32> to vector<8x128xf32>
    %34 = vector.shape_cast %31 : vector<8x128xf32> to vector<1x1x8x128xf32>
    tpu.vector_store %arg4[%c0_12, %c0_13, %c0_14, %c0_15], %34 {strides = array<i32>} : memref<1x3x8x128xf32, #tpu.memory_space<vmem>>, vector<1x1x8x128xf32>,
    %c0_16 = arith.constant 0 : index
    %c1 = arith.constant 1 : index
    %c0_17 = arith.constant 0 : index
    %c0_18 = arith.constant 0 : index
    %35 = vector.load %arg4[%c0_16, %c1, %c0_17, %c0_18] : memref<1x3x8x128xf32, #tpu.memory_space<vmem>>, vector<1x1x8x128xf32>
    %36 = vector.shape_cast %35 : vector<1x1x8x128xf32> to vector<8x128xf32>
    %37 = vector.shape_cast %23 : vector<16x128xf32> to vector<2x8x128xf32>
    %cst_19 = arith.constant dense<0.000000e+00> : vector<8x128xf32>
    %38 = vector.multi_reduction <add>, %37, %cst_19 [0] : vector<2x8x128xf32> to vector<8x128xf32>
    %39 = arith.addf %36, %38 : vector<8x128xf32>
    %c0_20 = arith.constant 0 : index
    %c1_21 = arith.constant 1 : index
    %c0_22 = arith.constant 0 : index
    %c0_23 = arith.constant 0 : index
    %40 = vector.load %arg4[%c0_20, %c1_21, %c0_22, %c0_23] : memref<1x3x8x128xf32, #tpu.memory_space<vmem>>, vector<1x1x8x128xf32>
    %41 = vector.shape_cast %40 : vector<1x1x8x128xf32> to vector<8x128xf32>
    %42 = vector.shape_cast %39 : vector<8x128xf32> to vector<1x1x8x128xf32>
    tpu.vector_store %arg4[%c0_20, %c1_21, %c0_22, %c0_23], %42 {strides = array<i32>} : memref<1x3x8x128xf32, #tpu.memory_space<vmem>>, vector<1x1x8x128xf32>,
    %c0_24 = arith.constant 0 : index
    %c2 = arith.constant 2 : index
    %c0_25 = arith.constant 0 : index
    %c0_26 = arith.constant 0 : index
    %43 = vector.load %arg4[%c0_24, %c2, %c0_25, %c0_26] : memref<1x3x8x128xf32, #tpu.memory_space<vmem>>, vector<1x1x8x128xf32>
    %44 = vector.shape_cast %43 : vector<1x1x8x128xf32> to vector<8x128xf32>
    %45 = vector.shape_cast %25 : vector<16x128xf32> to vector<2x8x128xf32>
    %cst_27 = arith.constant dense<0.000000e+00> : vector<8x128xf32>
    %46 = vector.multi_reduction <add>, %45, %cst_27 [0] : vector<2x8x128xf32> to vector<8x128xf32>
    %47 = arith.addf %44, %46 : vector<8x128xf32>
    %c0_28 = arith.constant 0 : index
    %c2_29 = arith.constant 2 : index
    %c0_30 = arith.constant 0 : index
    %c0_31 = arith.constant 0 : index
    %48 = vector.load %arg4[%c0_28, %c2_29, %c0_30, %c0_31] : memref<1x3x8x128xf32, #tpu.memory_space<vmem>>, vector<1x1x8x128xf32>
    %49 = vector.shape_cast %48 : vector<1x1x8x128xf32> to vector<8x128xf32>
    %50 = vector.shape_cast %47 : vector<8x128xf32> to vector<1x1x8x128xf32>
    tpu.vector_store %arg4[%c0_28, %c2_29, %c0_30, %c0_31], %50 {strides = array<i32>} : memref<1x3x8x128xf32, #tpu.memory_space<vmem>>, vector<1x1x8x128xf32>,
    return
  }
  func.func @transform_0(%arg0: i32, %arg1: i32) -> (i32, i32) {
    %c1_i32 = arith.constant 1 : i32
    %0 = arith.muli %arg0, %c1_i32 : i32
    %1 = arith.addi %0, %arg1 : i32
    %c0_i32 = arith.constant 0 : i32
    %2 = arith.minsi %1, %c0_i32 : i32
    %c0_i32_0 = arith.constant 0 : i32
    %c0_i32_1 = arith.constant 0 : i32
    return %2, %c0_i32_0 : i32, i32
  }
  func.func @transform_1(%arg0: i32, %arg1: i32) -> (i32, i32) {
    %c1_i32 = arith.constant 1 : i32
    %0 = arith.muli %arg0, %c1_i32 : i32
    %1 = arith.addi %0, %arg1 : i32
    %c0_i32 = arith.constant 0 : i32
    %2 = arith.minsi %1, %c0_i32 : i32
    %c0_i32_0 = arith.constant 0 : i32
    %c0_i32_1 = arith.constant 0 : i32
    return %2, %c0_i32_0 : i32, i32
  }
  func.func @transform_2(%arg0: i32, %arg1: i32) -> (i32, i32, i32, i32) {
    %c0_i32 = arith.constant 0 : i32
    %c0_i32_0 = arith.constant 0 : i32
    %c0_i32_1 = arith.constant 0 : i32
    %c0_i32_2 = arith.constant 0 : i32
    return %arg0, %c0_i32, %c0_i32_0, %c0_i32_1 : i32, i32, i32, i32
  }
}

</mosaic_0001>

<bundles_post_ra>
// kernel: tpu_custom_call.1
= control target key start
LH: loop header
LB: loop body
LE: loop exit
PB: predicated region body
PF: predicated region fallthrough
CT: control target
= control target key end

     0   :  { %7 = vsyncpa [#allocation3], 0  ;;  %s953_s0 = inlined_call_operand.hbm [shape: f32[16,128], index: 0, kind: input, shape index: {}]   ;;  %s954_s1 = inlined_call_operand.hbm [shape: f32[16,128], index: 1, kind: input, shape index: {}]   ;;  %s955_s2 = inlined_call_operand.hbm [shape: f32[2,3,8,128], index: 2, kind: output, shape index: {}]  }
   0x1   :  { %9 = vsyncpa [#allocation3 + $0x1], 0 }
   0x2   :  { %10 = vsyncpa [#allocation6], 0 }
   0x3   :  { %12 = vsyncpa [#allocation6 + $0x1], 0 }
   0x4   :  { %13 = vsyncpa [#allocation4], 0 }
   0x5   :  { %15 = vsyncpa [#allocation4 + $0x1], 0  ;;  %s770_s9 = smov 0   ;;  %s772_s10 = smov 0  }
   0x6   :  { %s774_s11 = smov 0   ;;  %s776_s12 = smov 0  }
   0x7   :  { %s778_s13 = smov 0   ;;  %s780_s14 = smov 0  }
   0x8   :  { %s782_s15 = smov 0   ;;  %s784_s16 = smov 0  }
   0x9 LB: > { %s449_s17 = sadd.s32 4294967295, %s747_s16   ;;  %s450_s18 = sadd.s32 4294967294, %s747_s16   ;;  %s747_s16 = sphi %s784_s16, %s21_s16   ;;  %s743_s15 = sphi %s782_s15, %s967_s15   ;;  %s739_s14 = sphi %s780_s14, %s966_s14   ;;  %s735_s13 = sphi %s778_s13, %s943_s13   ;;  %s731_s12 = sphi %s776_s12, %s965_s12   ;;  %s727_s11 = sphi %s774_s11, %s964_s11   ;;  %s723_s10 = sphi %s772_s10, %s963_s10   ;;  %s719_s9 = sphi %s770_s9, %s962_s9  }
   0xa   : > { %s33_s19 = sadd.s32 1, %s743_s15  ;;  %p716_p1 = scmp.ne.s32.totalorder %s735_s13, 0 }
   0xb   : > { %p35_p0 = scmp.ge.s32.totalorder %s33_s19, 2  ;;  %p54_p2 = scmp.eq.s32.totalorder %s747_s16, 0 }
   0xc   : > { %p59_p3 = scmp.ne.s32.totalorder %s735_s13, %s731_s12  ;;  %p60_p5 = scmp.eq.s32.totalorder %s449_s17, 0 }
   0xd   : > { %s969_s19 = smov (%p35_p0, %s33_s19), 0  ;;  %p816_p4 = por %p716_p1, %p54_p2 }
   0xe   : > { %p820_p6 = por %p60_p5, %p59_p3  ;;  %s101_s22 = ssub.s32 %s743_s15, %s969_s19 }
   0xf   : > { %p102_p7 = scmp.eq.s32.totalorder %s101_s22, 0  ;;  %s104_s23 = sadd.s32 1, %s727_s11 }
  0x10   : > { %p114_p8 = scmp.ne.s32.totalorder %s727_s11, %s723_s10  ;;  %p115_p9 = scmp.eq.s32.totalorder %s449_s17, 1 }
  0x11   : > { %s828_s24 = scalar_select %p102_p7, %s727_s11, %s104_s23  }
  0x12   : > { %p120_p10 = scmp.ne.s32.totalorder %s723_s10, %s719_s9  ;;  %p121_p11 = scmp.eq.s32.totalorder %s450_s18, 1 }
  0x13   : > { %p834_p12 = por %p115_p9, %p114_p8  ;;  %p452_p13 = scmp.ge.s32.totalorder %s747_s16, 2 }
  0x14   : > { %p839_p0 = por %p121_p11, %p120_p10  ;;  %p493_p1 = scmp.lt.s32.totalorder %s747_s16, 2 }
  0x15   : > { %s154_s29 = sshll.u32 %s953_s0, 4  ;;  %s749_s30 = smov [#allocation2]   ;;  %s155_s29 = int_to_ptr.hbm [resolvable:$true] %s154_s29 }
  0x16   : > { %s156_s3 = sshll.u32 %s749_s30, 4  ;;  %p849_p2 = pnand %p493_p1, %p816_p4  ;;  %s157_s3 = int_to_ptr.vmem [resolvable:$true] %s156_s3 }
  0x17   : > { %p459_p3 = scmp.ge.s32.totalorder %s747_s16, 1  ;;  %p189_p5 = scmp.lt.s32.totalorder %s747_s16, 3 }
  0x18   : > { %s580_s5 = sshra.s32 %s155_s29, 4  ;;  %p584_p8 = pneg %p849_p2  ;;  %s581_s5 = int_to_ptr.hbm [resolvable:$true] %s580_s5 }
  0x19   : > { %s582_s6 = scalar_lea.hbm %s581_s5, 16  ;;  %s587_s12 = scalar_lea.hbm %s953_s0, 16 }
  0x1a   : > { %p583_p7 = scmp.ne.s32.totalorder %s581_s5, %s582_s6  ;;  %p589_p4 = scmp.lt.s32.totalorder %s587_s12, %s582_s6 }
  0x1c   : > { %p585_p9 = pnand %p584_p8, %p583_p7 }
  0x1e   : > { %p586_p10 = pneg %p585_p9 }
  0x20   : > { %p591_p11 = pnand %p589_p4, %p586_p10 }
  0x22   : > { %594 = shalt.err (!%p591_p11)
}
  0x23   : > { %s750_s17 = smov 128   ;;  %s751_s18 = smov 8  }
  0x24   : > { %485 = dma.hbm_to_vmem [thread:$0]  (!%p849_p2), %s155_s29, 256, %s157_s3, [#allocation3], %s750_s17, %s750_s17, %s751_s18  }
  0x25   : > { %p869_p1 = pnand %p459_p3, %p189_p5  ;;  %s179_s27 = sshll.u32 %s954_s1, 4  ;;  %s180_s27 = int_to_ptr.hbm [resolvable:$true] %s179_s27 }
  0x26   : > { %s752_s28 = smov [#allocation5]   ;;  %s610_s5 = sshra.s32 %s180_s27, 4  ;;  %s611_s5 = int_to_ptr.hbm [resolvable:$true] %s610_s5 }
  0x27   : > { %s181_s30 = sshll.u32 %s752_s28, 4  ;;  %s612_s6 = scalar_lea.hbm %s611_s5, 16  ;;  %s182_s30 = int_to_ptr.vmem [resolvable:$true] %s181_s30 }
  0x28   : > { %p613_p7 = scmp.ne.s32.totalorder %s611_s5, %s612_s6  ;;  %s617_s7 = scalar_lea.hbm %s954_s1, 16 }
  0x29   : > { %p619_p3 = scmp.lt.s32.totalorder %s617_s7, %s612_s6 }
  0x2a   : > { %p615_p9 = pnand %p613_p7, %p584_p8 }
  0x2c   : > { %p616_p10 = pneg %p615_p9 }
  0x2e   : > { %p621_p5 = pnand %p619_p3, %p616_p10 }
  0x30   : > { %624 = shalt.err (!%p621_p5)
}
  0x31   : > { %488 = dma.hbm_to_vmem [thread:$0]  (!%p849_p2), %s180_s27, 256, %s182_s30, [#allocation6], %s750_s17, %s750_s17, %s751_s18  }
  0x32   : > { %193 = sbr.rel (%p869_p1) target bundleno = 97 (0x61), region = 28  ;;  %s195_s8 = sand.u32 (!%p869_p1), 1, %s735_s13  }
  0x33   : > { %s460_s12 = sshll.u32 (!%p869_p1), %s195_s8, 4  ;;  %s196_s22 = scalar_lea.sflag (!%p869_p1), [#allocation3], %s195_s8 }
  0x34   : > { %s199_s23 = scalar_lea.vmem (!%p869_p1), [#allocation2], %s460_s12 }
  0x37   : > { %705 = dma.done.wait (%p820_p6), %s196_s22, 256  }
  0x38   : > { %707 = vsyncadd (%p820_p6), %s196_s22, 4294967040  ;;  %s206_s28 = scalar_lea.sflag [#allocation6], %s195_s8  ;;  %s209_s5 = scalar_lea.vmem [#allocation5], %s460_s12 }
  0x39   : > { %709 = dma.done.wait (%p820_p6), %s206_s28, 256  }
  0x3a   : > { %711 = vsyncadd (%p820_p6), %s206_s28, 4294967040  ;;  %s462_s4 = sshll.u32 %s739_s14, 11  ;;  %v253_v0 = vlaneseq  ;;  %v267_v8 = vld [vmem:[%s199_s23] sm:$0xff]  ;;  %v268_v9 = vld [vmem:[%s199_s23 + $0x8] sm:$0xff]  ;;  %s233_s17 = sand.u32 1, %s723_s10  }
  0x3b   : > { %v260_v2 = vstv %s462_s4  ;;  %v463_v12 = vmul.f32 -1.442695, %v267_v8  ;;  %v464_v13 = vmul.f32 -1.442695, %v268_v9  ;;  %v269_v15 = vld [vmem:[%s209_s5] sm:$0xff]  ;;  %v270_v16 = vld [vmem:[%s209_s5 + $0x8] sm:$0xff] }
  0x3c   : > { %v254_v1 = vshrl.u32 %v253_v0, 7  ;;  %v257_v4 = vand.u32 127, %v253_v0  ;;  %s474_s21 = smul.u32 24, %s233_s17  ;;  %s330_s3 = scalar_lea.sflag [#allocation4], %s233_s17 }
  0x3d   : > { %572 = vpow2.f32 %v463_v12  ;;  %s475_s20 = smul.u32 24, %s739_s14  ;;  %s660_s23 = scalar_lea.hbm %s955_s2, 48 }
  0x3e   : > { %v255_v3 = vadd.s32 8, %v254_v1  ;;  %v258_v5 = vmul.u32 128, %v254_v1  ;;  %574 = vpow2.f32 %v464_v13  ;;  %s901_s18 = scalar_lea.vmem [#allocation7], %s474_s21 }
  0x3f   : > { %s341_s6 = scalar_lea.hbm %s955_s2, %s475_s20  ;;  %s342_s14 = sshll.u32 %s901_s18, 4  ;;  %s343_s14 = int_to_ptr.vmem [resolvable:$true] %s342_s14 }
  0x40   : > { %v259_v6 = vmul.u32 128, %v255_v3  ;;  %v261_v7 = vadd.s32 %v260_v2, %v258_v5  ;;  %s344_s29 = sshll.u32 %s341_s6, 4  ;;  %s345_s29 = int_to_ptr.hbm [resolvable:$true] %s344_s29 }
  0x41   : > { %s654_s7 = sshra.s32 %s345_s29, 4  ;;  %s655_s7 = int_to_ptr.hbm [resolvable:$true] %s654_s7 }
  0x42   : > { %v262_v10 = vadd.s32 %v260_v2, %v259_v6  ;;  %v263_v11 = vadd.s32 %v261_v7, %v257_v4  ;;  %s656_s8 = scalar_lea.hbm %s655_s7, 24  ;;  %p661_p4 = scmp.lt.s32.totalorder %s655_s7, %s955_s2 }
  0x43   : > { %v573_v20 = vpop.eup %572  ;;  %p657_p6 = scmp.ne.s32.totalorder %s655_s7, %s656_s8  ;;  %p662_p11 = scmp.lt.s32.totalorder %s660_s23, %s656_s8 }
  0x44   : > { %v264_v14 = vadd.s32 %v262_v10, %v257_v4  ;;  %vm265_vm0 = vcmp.lt.s32.totalorder %v263_v11, 2048  ;;  %v575_v21 = vpop.eup %574  ;;  %v277_v22 = vadd.f32 1.0, %v573_v20 }
  0x45   : > { %v311_v17 = vsel %vm265_vm0, %v269_v15, 0.0  ;;  %v278_v23 = vadd.f32 1.0, %v575_v21  ;;  %p658_p2 = pnand %p657_p6, %p834_p12  ;;  %p663_p1 = por %p662_p11, %p661_p4 }
  0x46   : > { %vm266_vm1 = vcmp.lt.s32.totalorder %v264_v14, 2048  ;;  %576 = vrcp.f32 %v277_v22  ;;  %vm284_vm2 = vweird.f32 %v277_v22  ;;  %v290_v27 = vand.u32 2147483648, %v277_v22 }
  0x47   : > { %v312_v18 = vsel %vm266_vm1, %v270_v16, 0.0  ;;  %578 = vrcp.f32 %v278_v23  ;;  %v288_v30 = vand.u32 2147483647, %v277_v22  ;;  %v305_v31 = vand.u32 2147483648, %v278_v23  ;;  %p659_p8 = pneg %p658_p2 }
  0x48   : > { %v326_v19 = vadd.f32 %v312_v18, %v311_v17  ;;  %vm299_vm4 = vweird.f32 %v278_v23  ;;  %v303_v33 = vand.u32 2147483647, %v278_v23  ;;  %v291_v35 = vor.u32 1.1754944e-38, %v290_v27 }
  0x49   : > { %vm289_vm7 = vcmp.eq.f32.partialorder %v288_v30, 8.507059e+37  ;;  %v306_v38 = vor.u32 1.1754944e-38, %v305_v31  ;;  %p664_p7 = pnand %p663_p1, %p659_p8 }
  0x4a   : > { %468 = vst [vmem:[%s901_s18 + $0x10] sm:$0xff] %v326_v19  ;;  %vm304_vm9 = vcmp.eq.f32.partialorder %v303_v33, 8.507059e+37 }
  0x4c   : > { %v577_v24 = vpop.eup %576 }
  0x4d   : > { %v579_v25 = vpop.eup %578  ;;  %v280_v26 = vmul.f32 %v577_v24, %v277_v22  ;;  %vm285_vm3 = vweird.f32 %v577_v24 }
  0x4e   : > { %v295_v28 = vmul.f32 %v579_v25, %v278_v23  ;;  %vm300_vm5 = vweird.f32 %v579_v25  ;;  %vm286_vm6 = vmor %vm284_vm2, %vm285_vm3 }
  0x4f   : > { %v281_v29 = vsub.f32 1.0, %v280_v26  ;;  %vm301_vm8 = vmor %vm299_vm4, %vm300_vm5 }
  0x50   : > { %v296_v32 = vsub.f32 1.0, %v295_v28 }
  0x51   : > { %v282_v34 = vmul.f32 %v577_v24, %v281_v29 }
  0x52   : > { %v297_v36 = vmul.f32 %v579_v25, %v296_v32 }
  0x53   : > { %v283_v37 = vadd.f32 %v577_v24, %v282_v34 }
  0x54   : > { %v298_v39 = vadd.f32 %v579_v25, %v297_v36 }
  0x55   : > { %v287_v40 = vsel %vm286_vm6, %v577_v24, %v283_v37 }
  0x56   : > { %v292_v41 = vsel %vm289_vm7, %v291_v35, %v287_v40  ;;  %v302_v42 = vsel %vm301_vm8, %v579_v25, %v298_v39 }
  0x57   : > { %v307_v43 = vsel %vm304_vm9, %v306_v38, %v302_v42  ;;  %v309_v44 = vsel %vm265_vm0, %v292_v41, 0.0 }
  0x58   : > { %v310_v45 = vsel %vm266_vm1, %v307_v43, 0.0  ;;  %v314_v46 = vmul.f32 %v311_v17, %v309_v44 }
  0x59   : > { %v315_v47 = vmul.f32 %v312_v18, %v310_v45  ;;  %v321_v48 = vadd.f32 %v310_v45, %v309_v44 }
  0x5b   : > { %v316_v49 = vadd.f32 %v315_v47, %v314_v46  ;;  %466 = vst [vmem:[%s901_s18 + $0x8] sm:$0xff] %v321_v48 }
  0x5d   : > { %318 = vst [vmem:[%s901_s18] sm:$0xff] %v316_v49 }
  0x5e   : > { %667 = shalt.err (!%p664_p7)
}
  0x5f   : > { %s753_s4 = smov 128   ;;  %s754_s17 = smov 8  }
  0x60   : > { %480 = dma.vmem_to_hbm [thread:$0]  (%p834_p12), %s343_s14, 384, %s345_s29, %s330_s3, %s753_s4, %s753_s4, %s754_s17  }
  0x61 PF: > { %s359_s21 = sand.u32 1, %s719_s9   ;;  %p490_p9 = pnand %p452_p13, %p839_p0 }
  0x62   : > { %s360_s18 = scalar_lea.sflag [#allocation4], %s359_s21 }
  0x63   : > { %p491_p10 = pneg %p490_p9 }
  0x65   : > { %713 = dma.done.wait (%p491_p10), %s360_s18, 384  }
  0x66   : > { %715 = vsyncadd (%p491_p10), %s360_s18, 4294966912  ;;  %s21_s16 = sadd.s32 1, %s747_s16   ;;  %s962_s9 = smov %s723_s10 }
  0x67   : > { %p18_p3 = scmp.ge.s32.totalorder %s21_s16, 4   ;;  %s963_s10 = smov %s727_s11 }
  0x68   : > { %s964_s11 = smov %s828_s24  ;;  %s965_s12 = smov %s735_s13 }
  0x69   : > { %s943_s13 = smov 0   ;;  %s966_s14 = smov %s743_s15 }
  0x6a   : > { %s967_s15 = smov %s969_s19  ;;  %20 = sbr.rel (!%p18_p3) target bundleno = 9 (0x9), region = 92 }
  0x6f   :  { %366 = vsyncpa [#allocation3], 1 }
  0x70   :  { %368 = vsyncpa [#allocation3 + $0x1], 1 }
  0x71   :  { %369 = vsyncpa [#allocation6], 1 }
  0x72   :  { %371 = vsyncpa [#allocation6 + $0x1], 1 }
  0x73   :  { %372 = vsyncpa [#allocation4], 1 }
  0x74   :  { %374 = vsyncpa [#allocation4 + $0x1], 1 }

</bundles_post_ra>
